<compile_context>
chip_gen: v5e
topology: v5e:2x2
jax: 0.10.0
libtpu: 0.0.40
codegen_flags: <defaults>
</compile_context>

<pallas_src>
import functools

import jax
import jax.numpy as jnp
import numpy as np
from jax import lax
from jax.experimental import pallas as pl
from jax.experimental.pallas import tpu as pltpu

_INT32_MAX = 0x7FFFFFFF


def _item_mask_kernel(seq_ref, score_ref, lens_ref, sub_ref, out_ref, *, mask_id):
    """One batch tile. Layout: (L, TB) -- positions on sublanes, batch on lanes."""
    seq = seq_ref[...]            # (L, TB) int32
    lens = lens_ref[...]          # (1, TB) int32
    sub_len = sub_ref[...]        # (1, TB) int32
    score = score_ref[...]        # (L, TB) int32; invalid positions == INT32_MAX
    L = seq.shape[0]

    pos = lax.broadcasted_iota(jnp.int32, seq.shape, 0)   # position index per lane

    # rank_i = #{k : (score_k, k) < (score_i, i)}.  Invalid positions carry
    # score INT32_MAX and index >= seq_len, so they never lower a valid rank;
    # among the seq_len valid positions the ranks are a permutation 0..len-1.
    def body(k, rank):
        sk = score_ref[pl.ds(k, 1), :]                    # (1, TB) sublane read
        less = (sk < score) | ((sk == score) & (k < pos))
        return rank + less.astype(jnp.int32)

    rank = lax.fori_loop(0, L, body, jnp.zeros(seq.shape, jnp.int32),
                         unroll=min(8, L))

    mask = (pos < lens) & (rank < sub_len)
    out_ref[...] = jnp.where(mask, jnp.int32(mask_id), seq)


def item_mask(sequences, seq_lens, key, *, mask_id, gamma=0.7, batch_tile=512):
    """Pallas implementation of Item_Mask.forward.

    sequences: (B, L) int, seq_lens: (B,) int, key: jax PRNG key.
    Returns (masked_sequences (B, L), seq_lens).
    """
    B, L = sequences.shape
    seq32 = jnp.asarray(sequences, jnp.int32)
    lens32 = jnp.asarray(seq_lens, jnp.int32)

    # sub_len = int(gamma * seq_len): match the reference's Python (float64)
    # truncation exactly when seq_lens is concrete; float32 fallback under jit.
    try:
        lens_host = np.asarray(jax.device_get(seq_lens)).astype(np.float64)
        sub32 = jnp.asarray(np.floor(np.float64(gamma) * lens_host).astype(np.int32))
    except Exception:  # traced under jit
        sub32 = jnp.floor(lens32.astype(jnp.float32) * jnp.float32(gamma)).astype(jnp.int32)

    # Lane-dense working layout: (L, B) with the batch on the lane axis.
    seq_t = seq32.T
    lens_row = lens32.reshape(1, B)
    sub_row = sub32.reshape(1, B)

    pos = lax.broadcasted_iota(jnp.int32, (L, B), 0)
    raw = lax.bitcast_convert_type(
        jax.random.bits(key, (L, B), dtype=jnp.uint32), jnp.int32)
    # Pre-fold validity into the scores (removes per-k validity work in-kernel).
    scores = jnp.where(pos < lens_row, raw, jnp.int32(_INT32_MAX))

    # Batch (lane) tile width; pad the batch so it tiles cleanly.
    if B > batch_tile:
        TB = max(128, (batch_tile // 128) * 128)          # multiple of 128
        Bp = ((B + TB - 1) // TB) * TB
    else:
        TB = B                                            # single tile == full array
        Bp = B
    if Bp != B:
        pad = Bp - B
        seq_t = jnp.pad(seq_t, ((0, 0), (0, pad)))
        scores = jnp.pad(scores, ((0, 0), (0, pad)), constant_values=_INT32_MAX)
        lens_row = jnp.pad(lens_row, ((0, 0), (0, pad)))   # len 0 -> nothing masked
        sub_row = jnp.pad(sub_row, ((0, 0), (0, pad)))

    grid = (Bp // TB,)
    spec_LB = pl.BlockSpec((L, TB), lambda i: (0, i))
    spec_1B = pl.BlockSpec((1, TB), lambda i: (0, i))

    tile_bytes = L * TB * 4
    vmem_limit = int(min(32 * 1024 * 1024, max(16 * tile_bytes, 4 * 1024 * 1024)))

    kernel = functools.partial(_item_mask_kernel, mask_id=int(mask_id))
    out_t = pl.pallas_call(
        kernel,
        out_shape=jax.ShapeDtypeStruct((L, Bp), jnp.int32),
        grid=grid,
        in_specs=[spec_LB, spec_LB, spec_1B, spec_1B],
        out_specs=spec_LB,
        compiler_params=pltpu.CompilerParams(
            dimension_semantics=("parallel",),
            vmem_limit_bytes=vmem_limit),
        cost_estimate=pl.CostEstimate(
            flops=7 * L * L * Bp,
            transcendentals=0,
            bytes_accessed=(3 * L * Bp + 2 * Bp) * 4),
    )(seq_t, scores, lens_row, sub_row)

    masked = out_t[:, :B].T.astype(sequences.dtype)
    return masked, seq_lens


if __name__ == "__main__":
    key = jax.random.PRNGKey(0)
    k_seq, k_scores = jax.random.split(key)

    B, L = 2, 8
    mask_id = 0
    gamma = 0.7

    # item ids >= 1 so mask_id never collides with real items
    sequences = jax.random.randint(k_seq, (B, L), 1, 100, dtype=jnp.int32)
    seq_lens = jnp.array([8, 5], dtype=jnp.int32)

    masked, out_lens = item_mask(sequences, seq_lens, k_scores,
                                 mask_id=mask_id, gamma=gamma)
    masked = jax.block_until_ready(masked)

    # invariants of Item_Mask semantics
    m = np.asarray(masked)
    s = np.asarray(sequences)
    ls = np.asarray(seq_lens)
    assert np.array_equal(np.asarray(out_lens), ls)
    for i in range(B):
        sl = int(ls[i])
        sub = int(gamma * sl)
        changed = m[i] != s[i]
        assert changed[sl:].sum() == 0                 # nothing past seq_len touched
        assert (m[i][changed] == mask_id).all()        # changed positions == mask_id
        assert int(changed[:sl].sum()) == sub          # exactly int(gamma*seq_len) masked

    print("KERNEL_OK")
</pallas_src>

<mosaic_0001>
module attributes {stable_mosaic.version = 11 : i64} {
  func.func @_item_mask_kernel(%arg0: i32, %arg1: memref<8x2xi32, #tpu.memory_space<vmem>>, %arg2: memref<8x2xi32, #tpu.memory_space<vmem>>, %arg3: memref<1x2xi32, #tpu.memory_space<vmem>>, %arg4: memref<1x2xi32, #tpu.memory_space<vmem>>, %arg5: memref<8x2xi32, #tpu.memory_space<vmem>>) attributes {dimension_semantics = [#tpu.dimension_semantics<parallel>], iteration_bounds = array<i64: 1>, scalar_prefetch = 0 : i64, scratch_operands = 0 : i64, tpu.core_type = #tpu.core_type<tc>, window_params = [{transform_indices = @transform_0, window_bounds = array<i64: 8, 2>}, {transform_indices = @transform_1, window_bounds = array<i64: 8, 2>}, {transform_indices = @transform_2, window_bounds = array<i64: 1, 2>}, {transform_indices = @transform_3, window_bounds = array<i64: 1, 2>}, {transform_indices = @transform_4, window_bounds = array<i64: 8, 2>}]} {
    %c0 = arith.constant 0 : index
    %c0_0 = arith.constant 0 : index
    %0 = vector.load %arg1[%c0, %c0_0] : memref<8x2xi32, #tpu.memory_space<vmem>>, vector<8x2xi32>
    %c0_1 = arith.constant 0 : index
    %c0_2 = arith.constant 0 : index
    %1 = vector.load %arg3[%c0_1, %c0_2] : memref<1x2xi32, #tpu.memory_space<vmem>>, vector<1x2xi32>
    %c0_3 = arith.constant 0 : index
    %c0_4 = arith.constant 0 : index
    %2 = vector.load %arg4[%c0_3, %c0_4] : memref<1x2xi32, #tpu.memory_space<vmem>>, vector<1x2xi32>
    %c0_5 = arith.constant 0 : index
    %c0_6 = arith.constant 0 : index
    %3 = vector.load %arg2[%c0_5, %c0_6] : memref<8x2xi32, #tpu.memory_space<vmem>>, vector<8x2xi32>
    %4 = tpu.iota {dimensions = array<i32: 0>} : vector<8x2xi32>
    %c0_i32 = arith.constant 0 : i32
    %5 = vector.broadcast %c0_i32 : i32 to vector<8x2xi32>
    %c0_i32_7 = arith.constant 0 : i32
    %6 = arith.index_cast %c0_i32_7 : i32 to index
    %c0_8 = arith.constant 0 : index
    %7 = vector.load %arg2[%6, %c0_8] : memref<8x2xi32, #tpu.memory_space<vmem>>, vector<1x2xi32>
    %8 = vector.broadcast %7 : vector<1x2xi32> to vector<8x2xi32>
    %9 = arith.cmpi slt, %8, %3 : vector<8x2xi32>
    %10 = vector.broadcast %7 : vector<1x2xi32> to vector<8x2xi32>
    %11 = arith.cmpi eq, %10, %3 : vector<8x2xi32>
    %12 = vector.broadcast %c0_i32_7 : i32 to vector<8x2xi32>
    %13 = arith.cmpi slt, %12, %4 : vector<8x2xi32>
    %14 = arith.andi %11, %13 : vector<8x2xi1>
    %15 = arith.ori %9, %14 : vector<8x2xi1>
    %16 = arith.extui %15 : vector<8x2xi1> to vector<8x2xi32>
    %17 = arith.addi %5, %16 : vector<8x2xi32>
    %c1_i32 = arith.constant 1 : i32
    %18 = arith.index_cast %c1_i32 : i32 to index
    %c0_9 = arith.constant 0 : index
    %19 = vector.load %arg2[%18, %c0_9] : memref<8x2xi32, #tpu.memory_space<vmem>>, vector<1x2xi32>
    %20 = vector.broadcast %19 : vector<1x2xi32> to vector<8x2xi32>
    %21 = arith.cmpi slt, %20, %3 : vector<8x2xi32>
    %22 = vector.broadcast %19 : vector<1x2xi32> to vector<8x2xi32>
    %23 = arith.cmpi eq, %22, %3 : vector<8x2xi32>
    %24 = vector.broadcast %c1_i32 : i32 to vector<8x2xi32>
    %25 = arith.cmpi slt, %24, %4 : vector<8x2xi32>
    %26 = arith.andi %23, %25 : vector<8x2xi1>
    %27 = arith.ori %21, %26 : vector<8x2xi1>
    %28 = arith.extui %27 : vector<8x2xi1> to vector<8x2xi32>
    %29 = arith.addi %17, %28 : vector<8x2xi32>
    %c2_i32 = arith.constant 2 : i32
    %30 = arith.index_cast %c2_i32 : i32 to index
    %c0_10 = arith.constant 0 : index
    %31 = vector.load %arg2[%30, %c0_10] : memref<8x2xi32, #tpu.memory_space<vmem>>, vector<1x2xi32>
    %32 = vector.broadcast %31 : vector<1x2xi32> to vector<8x2xi32>
    %33 = arith.cmpi slt, %32, %3 : vector<8x2xi32>
    %34 = vector.broadcast %31 : vector<1x2xi32> to vector<8x2xi32>
    %35 = arith.cmpi eq, %34, %3 : vector<8x2xi32>
    %36 = vector.broadcast %c2_i32 : i32 to vector<8x2xi32>
    %37 = arith.cmpi slt, %36, %4 : vector<8x2xi32>
    %38 = arith.andi %35, %37 : vector<8x2xi1>
    %39 = arith.ori %33, %38 : vector<8x2xi1>
    %40 = arith.extui %39 : vector<8x2xi1> to vector<8x2xi32>
    %41 = arith.addi %29, %40 : vector<8x2xi32>
    %c3_i32 = arith.constant 3 : i32
    %42 = arith.index_cast %c3_i32 : i32 to index
    %c0_11 = arith.constant 0 : index
    %43 = vector.load %arg2[%42, %c0_11] : memref<8x2xi32, #tpu.memory_space<vmem>>, vector<1x2xi32>
    %44 = vector.broadcast %43 : vector<1x2xi32> to vector<8x2xi32>
    %45 = arith.cmpi slt, %44, %3 : vector<8x2xi32>
    %46 = vector.broadcast %43 : vector<1x2xi32> to vector<8x2xi32>
    %47 = arith.cmpi eq, %46, %3 : vector<8x2xi32>
    %48 = vector.broadcast %c3_i32 : i32 to vector<8x2xi32>
    %49 = arith.cmpi slt, %48, %4 : vector<8x2xi32>
    %50 = arith.andi %47, %49 : vector<8x2xi1>
    %51 = arith.ori %45, %50 : vector<8x2xi1>
    %52 = arith.extui %51 : vector<8x2xi1> to vector<8x2xi32>
    %53 = arith.addi %41, %52 : vector<8x2xi32>
    %c4_i32 = arith.constant 4 : i32
    %54 = arith.index_cast %c4_i32 : i32 to index
    %c0_12 = arith.constant 0 : index
    %55 = vector.load %arg2[%54, %c0_12] : memref<8x2xi32, #tpu.memory_space<vmem>>, vector<1x2xi32>
    %56 = vector.broadcast %55 : vector<1x2xi32> to vector<8x2xi32>
    %57 = arith.cmpi slt, %56, %3 : vector<8x2xi32>
    %58 = vector.broadcast %55 : vector<1x2xi32> to vector<8x2xi32>
    %59 = arith.cmpi eq, %58, %3 : vector<8x2xi32>
    %60 = vector.broadcast %c4_i32 : i32 to vector<8x2xi32>
    %61 = arith.cmpi slt, %60, %4 : vector<8x2xi32>
    %62 = arith.andi %59, %61 : vector<8x2xi1>
    %63 = arith.ori %57, %62 : vector<8x2xi1>
    %64 = arith.extui %63 : vector<8x2xi1> to vector<8x2xi32>
    %65 = arith.addi %53, %64 : vector<8x2xi32>
    %c5_i32 = arith.constant 5 : i32
    %66 = arith.index_cast %c5_i32 : i32 to index
    %c0_13 = arith.constant 0 : index
    %67 = vector.load %arg2[%66, %c0_13] : memref<8x2xi32, #tpu.memory_space<vmem>>, vector<1x2xi32>
    %68 = vector.broadcast %67 : vector<1x2xi32> to vector<8x2xi32>
    %69 = arith.cmpi slt, %68, %3 : vector<8x2xi32>
    %70 = vector.broadcast %67 : vector<1x2xi32> to vector<8x2xi32>
    %71 = arith.cmpi eq, %70, %3 : vector<8x2xi32>
    %72 = vector.broadcast %c5_i32 : i32 to vector<8x2xi32>
    %73 = arith.cmpi slt, %72, %4 : vector<8x2xi32>
    %74 = arith.andi %71, %73 : vector<8x2xi1>
    %75 = arith.ori %69, %74 : vector<8x2xi1>
    %76 = arith.extui %75 : vector<8x2xi1> to vector<8x2xi32>
    %77 = arith.addi %65, %76 : vector<8x2xi32>
    %c6_i32 = arith.constant 6 : i32
    %78 = arith.index_cast %c6_i32 : i32 to index
    %c0_14 = arith.constant 0 : index
    %79 = vector.load %arg2[%78, %c0_14] : memref<8x2xi32, #tpu.memory_space<vmem>>, vector<1x2xi32>
    %80 = vector.broadcast %79 : vector<1x2xi32> to vector<8x2xi32>
    %81 = arith.cmpi slt, %80, %3 : vector<8x2xi32>
    %82 = vector.broadcast %79 : vector<1x2xi32> to vector<8x2xi32>
    %83 = arith.cmpi eq, %82, %3 : vector<8x2xi32>
    %84 = vector.broadcast %c6_i32 : i32 to vector<8x2xi32>
    %85 = arith.cmpi slt, %84, %4 : vector<8x2xi32>
    %86 = arith.andi %83, %85 : vector<8x2xi1>
    %87 = arith.ori %81, %86 : vector<8x2xi1>
    %88 = arith.extui %87 : vector<8x2xi1> to vector<8x2xi32>
    %89 = arith.addi %77, %88 : vector<8x2xi32>
    %c7_i32 = arith.constant 7 : i32
    %90 = arith.index_cast %c7_i32 : i32 to index
    %c0_15 = arith.constant 0 : index
    %91 = vector.load %arg2[%90, %c0_15] : memref<8x2xi32, #tpu.memory_space<vmem>>, vector<1x2xi32>
    %92 = vector.broadcast %91 : vector<1x2xi32> to vector<8x2xi32>
    %93 = arith.cmpi slt, %92, %3 : vector<8x2xi32>
    %94 = vector.broadcast %91 : vector<1x2xi32> to vector<8x2xi32>
    %95 = arith.cmpi eq, %94, %3 : vector<8x2xi32>
    %96 = vector.broadcast %c7_i32 : i32 to vector<8x2xi32>
    %97 = arith.cmpi slt, %96, %4 : vector<8x2xi32>
    %98 = arith.andi %95, %97 : vector<8x2xi1>
    %99 = arith.ori %93, %98 : vector<8x2xi1>
    %100 = arith.extui %99 : vector<8x2xi1> to vector<8x2xi32>
    %101 = arith.addi %89, %100 : vector<8x2xi32>
    %c8_i32 = arith.constant 8 : i32
    %102 = vector.broadcast %1 : vector<1x2xi32> to vector<8x2xi32>
    %103 = arith.cmpi slt, %4, %102 : vector<8x2xi32>
    %104 = vector.broadcast %2 : vector<1x2xi32> to vector<8x2xi32>
    %105 = arith.cmpi slt, %101, %104 : vector<8x2xi32>
    %106 = arith.andi %103, %105 : vector<8x2xi1>
    %c0_i32_16 = arith.constant 0 : i32
    %107 = vector.broadcast %c0_i32_16 : i32 to vector<8x2xi32>
    %108 = arith.select %106, %107, %0 : vector<8x2xi1>, vector<8x2xi32>
    %c0_17 = arith.constant 0 : index
    %c0_18 = arith.constant 0 : index
    %109 = vector.load %arg5[%c0_17, %c0_18] : memref<8x2xi32, #tpu.memory_space<vmem>>, vector<8x2xi32>
    tpu.vector_store %arg5[%c0_17, %c0_18], %108 {strides = array<i32>} : memref<8x2xi32, #tpu.memory_space<vmem>>, vector<8x2xi32>,
    return
  }
  func.func @transform_0(%arg0: i32) -> (i32, i32) {
    %c0_i32 = arith.constant 0 : i32
    %c0_i32_0 = arith.constant 0 : i32
    return %c0_i32, %arg0 : i32, i32
  }
  func.func @transform_1(%arg0: i32) -> (i32, i32) {
    %c0_i32 = arith.constant 0 : i32
    %c0_i32_0 = arith.constant 0 : i32
    return %c0_i32, %arg0 : i32, i32
  }
  func.func @transform_2(%arg0: i32) -> (i32, i32) {
    %c0_i32 = arith.constant 0 : i32
    %c0_i32_0 = arith.constant 0 : i32
    return %c0_i32, %arg0 : i32, i32
  }
  func.func @transform_3(%arg0: i32) -> (i32, i32) {
    %c0_i32 = arith.constant 0 : i32
    %c0_i32_0 = arith.constant 0 : i32
    return %c0_i32, %arg0 : i32, i32
  }
  func.func @transform_4(%arg0: i32) -> (i32, i32) {
    %c0_i32 = arith.constant 0 : i32
    %c0_i32_0 = arith.constant 0 : i32
    return %c0_i32, %arg0 : i32, i32
  }
}

</mosaic_0001>

<bundles_post_ra>
// kernel: tpu_custom_call.1
= control target key start
LH: loop header
LB: loop body
LE: loop exit
PB: predicated region body
PF: predicated region fallthrough
CT: control target
= control target key end

     0   :  { %v21_v0 = vlaneseq  ;;  %v117_v8 = vmov 0   ;;  %s192_s1 = inlined_call_operand.vmem [shape: s32[8,2], index: 1, kind: input, shape index: {}]   ;;  %s193_s2 = inlined_call_operand.vmem [shape: s32[1,2], index: 2, kind: input, shape index: {}]   ;;  %s194_s3 = inlined_call_operand.vmem [shape: s32[1,2], index: 3, kind: input, shape index: {}]   ;;  %s195_s0 = inlined_call_operand.vmem [shape: s32[8,2], index: 0, kind: input, shape index: {}]   ;;  %s196_s4 = inlined_call_operand.vmem [shape: s32[8,2], index: 4, kind: output, shape index: {}]  }
   0x1   :  { %v20_v1 = vld [vmem:[%s192_s1] sm:$0xff] }
   0x2   :  { %v146_v2 = vshrl.u32 %v21_v0, 7  ;;  %v107_v3 = vld [vmem:[%s192_s1] ss:$0 sm:$0xff]  ;;  %v108_v4 = vld [vmem:[%s192_s1 + $0x1] ss:$0 sm:$0xff] }
   0x3   :  { %vm25_vm0 = vcmp.lt.s32.totalorder %v107_v3, %v20_v1  ;;  %vm26_vm1 = vcmp.eq.s32.totalorder %v107_v3, %v20_v1  ;;  %v109_v5 = vld [vmem:[%s192_s1 + $0x2] ss:$0 sm:$0xff]  ;;  %vm33_vm5 = vcmp.lt.s32.totalorder %v108_v4, %v20_v1  ;;  %vm34_vm6 = vcmp.eq.s32.totalorder %v108_v4, %v20_v1  ;;  %v110_v6 = vld [vmem:[%s192_s1 + $0x3] ss:$0 sm:$0xff]  ;;  %v111_v7 = vld [vmem:[%s192_s1 + $0x4] ss:$0 sm:$0xff] }
   0x4   :  { %vm27_vm2 = vcmp.gt.s32.totalorder %v146_v2, 0  ;;  %vm35_vm3 = vcmp.gt.s32.totalorder %v146_v2, 1  ;;  %vm43_vm8 = vcmp.eq.s32.totalorder %v109_v5, %v20_v1  ;;  %vm44_vm9 = vcmp.gt.s32.totalorder %v146_v2, 2  ;;  %v112_v10 = vld [vmem:[%s192_s1 + $0x5] ss:$0 sm:$0xff] }
   0x5   :  { %vm28_vm4 = vmand %vm26_vm1, %vm27_vm2  ;;  %vm42_vm11 = vcmp.lt.s32.totalorder %v109_v5, %v20_v1  ;;  %vm52_vm13 = vcmp.eq.s32.totalorder %v110_v6, %v20_v1  ;;  %vm53_vm14 = vcmp.gt.s32.totalorder %v146_v2, 3  ;;  %vm61_vm2 = vcmp.eq.s32.totalorder %v111_v7, %v20_v1  ;;  %v113_v13 = vld [vmem:[%s192_s1 + $0x6] ss:$0 sm:$0xff]  ;;  %v114_v16 = vld [vmem:[%s192_s1 + $0x7] ss:$0 sm:$0xff] }
   0x6   :  { %vm29_vm7 = vmor %vm25_vm0, %vm28_vm4  ;;  %vm51_vm0 = vcmp.lt.s32.totalorder %v110_v6, %v20_v1  ;;  %vm62_vm4 = vcmp.gt.s32.totalorder %v146_v2, 4  ;;  %v115_v23 = vld [vmem:[%s193_s2] ss:$0 sm:$0xff] }
   0x7   :  { %v30_v9 = vsel %vm29_vm7, 1, %v117_v8  ;;  %vm36_vm10 = vmand %vm34_vm6, %vm35_vm3  ;;  %vm70_vm7 = vcmp.eq.s32.totalorder %v112_v10, %v20_v1  ;;  %v116_v27 = vld [vmem:[%s194_s3] ss:$0 sm:$0xff] }
   0x8   :  { %vm37_vm12 = vmor %vm33_vm5, %vm36_vm10  ;;  %vm60_vm5 = vcmp.lt.s32.totalorder %v111_v7, %v20_v1  ;;  %vm71_vm10 = vcmp.gt.s32.totalorder %v146_v2, 5  ;;  %v17_v29 = vld [vmem:[%s195_s0] sm:$0xff] }
   0x9   :  { %v38_v11 = vsel %vm37_vm12, 1, %v117_v8  ;;  %vm45_vm15 = vmand %vm43_vm8, %vm44_vm9  ;;  %vm69_vm9 = vcmp.lt.s32.totalorder %v112_v10, %v20_v1  ;;  %vm79_vm12 = vcmp.eq.s32.totalorder %v113_v13, %v20_v1 }
   0xa   :  { %v39_v12 = vadd.s32 %v38_v11, %v30_v9  ;;  %vm46_vm1 = vmor %vm42_vm11, %vm45_vm15  ;;  %vm80_vm15 = vcmp.gt.s32.totalorder %v146_v2, 6 }
   0xb   :  { %v47_v14 = vsel %vm46_vm1, 1, %v117_v8  ;;  %vm54_vm3 = vmand %vm52_vm13, %vm53_vm14  ;;  %vm78_vm14 = vcmp.lt.s32.totalorder %v113_v13, %v20_v1  ;;  %vm87_vm1 = vcmp.lt.s32.totalorder %v114_v16, %v20_v1 }
   0xc   :  { %v48_v15 = vadd.s32 %v47_v14, %v39_v12  ;;  %vm55_vm6 = vmor %vm51_vm0, %vm54_vm3  ;;  %v92_v25 = vsel %vm87_vm1, 1, %v117_v8 }
   0xd   :  { %v56_v17 = vsel %vm55_vm6, 1, %v117_v8  ;;  %vm63_vm8 = vmand %vm61_vm2, %vm62_vm4  ;;  %vm95_vm2 = vcmp.lt.s32.totalorder %v146_v2, %v115_v23 }
   0xe   :  { %v57_v18 = vadd.s32 %v56_v17, %v48_v15  ;;  %vm64_vm11 = vmor %vm60_vm5, %vm63_vm8  ;;  %vm100_vm5 = vcmask 15360  }
   0xf   :  { %v65_v19 = vsel %vm64_vm11, 1, %v117_v8  ;;  %vm72_vm13 = vmand %vm70_vm7, %vm71_vm10 }
  0x10   :  { %v66_v20 = vadd.s32 %v65_v19, %v57_v18  ;;  %vm73_vm0 = vmor %vm69_vm9, %vm72_vm13 }
  0x11   :  { %v74_v21 = vsel %vm73_vm0, 1, %v117_v8  ;;  %vm81_vm3 = vmand %vm79_vm12, %vm80_vm15 }
  0x12   :  { %v75_v22 = vadd.s32 %v74_v21, %v66_v20  ;;  %vm82_vm6 = vmor %vm78_vm14, %vm81_vm3 }
  0x13   :  { %v83_v24 = vsel %vm82_vm6, 1, %v117_v8 }
  0x14   :  { %v84_v26 = vadd.s32 %v83_v24, %v75_v22 }
  0x16   :  { %v93_v28 = vadd.s32 %v92_v25, %v84_v26 }
  0x18   :  { %vm97_vm4 = vcmp.lt.s32.totalorder %v93_v28, %v116_v27 }
  0x19   :  { %vm98_vm7 = vmand %vm95_vm2, %vm97_vm4 }
  0x1a   :  { %v99_v30 = vsel %vm98_vm7, 0, %v17_v29 }
  0x1b   :  { %101 = vst.msk [vmem:[%s196_s4] sm:$0xff] %vm100_vm5, %v99_v30 }

</bundles_post_ra>
